<compile_context>
chip_gen: v5e
topology: v5e:2x2
jax: 0.10.0
libtpu: 0.0.40
codegen_flags: <defaults>
</compile_context>

<pallas_src>
import functools

import jax
import jax.numpy as jnp
from jax.experimental import pallas as pl
from jax.experimental.pallas import tpu as pltpu

C1 = 0.01 ** 2
C2 = 0.03 ** 2


def _ssim_kernel(x_ref, y_ref, o_ref, *, sub_w):
    # x_ref / y_ref / o_ref: (B, H, L) with L = G * sub_w (G images packed
    # side-by-side along the lane axis, each sub_w wide).
    Bb, H, L = o_ref.shape

    x = x_ref[...].astype(jnp.float32)
    y = y_ref[...].astype(jnp.float32)

    # Lane-only / row-only reflection-correction signs (cheap to build: the
    # iotas are (1,1,L) and (1,H,1), not full blocks).  +1 on the first
    # column/row of each packed image, -1 on the last, 0 elsewhere.
    lane = jax.lax.broadcasted_iota(jnp.int32, (1, 1, L), 2)
    col = lane % sub_w
    edge_vec = (jnp.where(col == 0, 1.0, 0.0)
                + jnp.where(col == sub_w - 1, -1.0, 0.0)).astype(jnp.float32)
    row = jax.lax.broadcasted_iota(jnp.int32, (1, H, 1), 1)
    row_vec = (jnp.where(row == 0, 1.0, 0.0)
               + jnp.where(row == H - 1, -1.0, 0.0)).astype(jnp.float32)
    # Hoist the broadcasts: one broadcast each, reused by all five pools.
    edge_sign = jnp.broadcast_to(edge_vec, (Bb, H, L))
    row_sign = jnp.broadcast_to(row_vec, (Bb, H, L))

    def hsum(a):
        # 3-tap horizontal (lane) sum with per-image reflection at the edges.
        # Rotations run on the XLU slot; edge handling is one fused correction:
        #   interior : a + left + right
        #   first col: a + 2*right   (col -1 reflects to col 1)
        #   last  col: a + 2*left    (col W reflects to col W-2)
        left = pltpu.roll(a, 1, 2)        # left[..., j]  == a[..., j-1 mod L]
        right = pltpu.roll(a, L - 1, 2)   # right[..., j] == a[..., j+1 mod L]
        return a + left + right + edge_sign * (right - left)

    def vsum(a):
        # 3-tap vertical (sublane) sum with reflection at rows 0 / H-1.
        up = pltpu.roll(a, 1, 1)          # up[:, i, :] == a[:, i-1 mod H, :]
        dn = pltpu.roll(a, H - 1, 1)      # dn[:, i, :] == a[:, i+1 mod H, :]
        return a + up + dn + row_sign * (dn - up)

    def pool9(a):
        # Unnormalized separable 3x3 reflect-padded sum (1/9 folded into the
        # SSIM constants below).
        return vsum(hsum(a))

    sx = pool9(x)
    sy = pool9(y)
    sxx = pool9(x * x)
    syy = pool9(y * y)
    sxy = pool9(x * y)

    # mu = s/9, sigma = s2/9 - mu^2.  Scale both factors of numerator and
    # denominator by 81 (cancels in the ratio), so no per-pool *(1/9):
    #   num = (2*sx*sy + 81*C1) * (18*sxy - 2*sx*sy + 81*C2)
    #   den = (sx^2 + sy^2 + 81*C1) * (9*(sxx+syy) - (sx^2+sy^2) + 81*C2)
    pxy2 = 2.0 * (sx * sy)
    sq = sx * sx + sy * sy
    n = (pxy2 + 81.0 * C1) * (18.0 * sxy - pxy2 + 81.0 * C2)
    d = (sq + 81.0 * C1) * (9.0 * (sxx + syy) - sq + 81.0 * C2)

    # EUP approximate reciprocal + Newton-Raphson keeps the divide off the
    # VALU slot.  The second NR step (~3 cheap VPU ops) only guards
    # lower-precision fallbacks of the approx reciprocal (e.g. interpret
    # mode); with the hardware EUP seed it is a numerical no-op.
    r = pl.reciprocal(d, approx=True)
    r = r * (2.0 - d * r)
    r = r * (2.0 - d * r)

    out = (1.0 - n * r) * 0.5
    o_ref[...] = jnp.clip(out, 0.0, 1.0).astype(o_ref.dtype)


def _block_budget():
    """Returns (target bytes per input block, vmem_limit_bytes), per chip gen."""
    vmem_cap = None
    try:
        info = pltpu.get_tpu_info()
        vmem_cap = getattr(info, "vmem_capacity_bytes", None)
    except Exception:
        vmem_cap = None
    if vmem_cap is not None and vmem_cap >= 100 * 1024 * 1024:
        # v5e / v6e: 128 MiB physical VMEM -> bigger blocks, higher limit.
        return 3 * 1024 * 1024, 96 * 1024 * 1024
    # v7x (64 MiB per TensorCore) or unknown: stay conservative.
    return (3 * 1024 * 1024) // 2, 48 * 1024 * 1024


def ssim(x, y, *, target_block_bytes=None, vmem_limit_bytes=None):
    """SSIM loss map (matches the PyTorch SSIM module).

    x, y: (N, C, H, W).  Returns (N, C, H, W).
    """
    assert x.shape == y.shape
    N, C, H, W = x.shape
    assert H >= 2 and W >= 2, "ReflectionPad2d(1) requires H, W >= 2"
    NC = N * C

    tbb, vlb = _block_budget()
    if target_block_bytes is None:
        target_block_bytes = tbb
    if vmem_limit_bytes is None:
        vmem_limit_bytes = vlb

    # Lane-dense packing: G small images side-by-side along the lane axis so
    # the kernel's last dim is ~128 wide and output stores are unmasked vst.
    # TODO(synk): when G*W is not a multiple of 128 (e.g. W=48 -> L=96), pad
    # the packed lane dim up to 128 to keep stores unmasked.
    G = max(1, 128 // W)
    L = G * W
    itemsize = jnp.dtype(x.dtype).itemsize
    bytes_per_group = H * L * itemsize

    num_groups_raw = -(-NC // G)  # ceil

    # Groups per block: amortize the ~0.35us per-grid-step overhead while
    # keeping (live temporaries + double-buffered I/O) inside the VMEM budget.
    B = max(1, min(num_groups_raw,
                   target_block_bytes // max(1, bytes_per_group)))
    steps = -(-num_groups_raw // B)
    # Prefer a reasonably deep, even grid (v7x has two TensorCores + needs
    # pipeline depth); pad with zero groups instead of a divisor search.
    steps = max(steps, min(num_groups_raw, 8))
    if steps > 1 and steps % 2:
        steps += 1
    B = -(-num_groups_raw // steps)
    num_groups = steps * B
    NCp = num_groups * G

    xf = x.reshape(NC, H, W)
    yf = y.reshape(NC, H, W)
    if NCp != NC:
        padn = ((0, NCp - NC), (0, 0), (0, 0))
        xf = jnp.pad(xf, padn)  # zero images: SSIM(0,0)=0 is finite; sliced off
        yf = jnp.pad(yf, padn)

    def pack(a):
        # TODO(synk): verify XLA fuses these relayout transposes with the pad,
        # or move the packing into the kernel (XLU relayout) once the in-kernel
        # VPU cuts make them a visible fraction of the wall clock.
        return (a.reshape(num_groups, G, H, W)
                 .transpose(0, 2, 1, 3)
                 .reshape(num_groups, H, L))

    xg = pack(xf)
    yg = pack(yf)

    out = pl.pallas_call(
        functools.partial(_ssim_kernel, sub_w=W),
        out_shape=jax.ShapeDtypeStruct((num_groups, H, L), x.dtype),
        grid_spec=pltpu.PrefetchScalarGridSpec(
            num_scalar_prefetch=0,
            grid=(steps,),
            in_specs=[
                pl.BlockSpec((B, H, L), lambda i: (i, 0, 0)),
                pl.BlockSpec((B, H, L), lambda i: (i, 0, 0)),
            ],
            out_specs=pl.BlockSpec((B, H, L), lambda i: (i, 0, 0)),
        ),
        compiler_params=pltpu.CompilerParams(
            dimension_semantics=("parallel",),
            vmem_limit_bytes=vmem_limit_bytes,
        ),
    )(xg, yg)

    # Unpack the lane-packed layout back to (N, C, H, W).
    out = (out.reshape(num_groups, H, G, W)
              .transpose(0, 2, 1, 3)
              .reshape(NCp, H, W)[:NC]
              .reshape(N, C, H, W))
    return out


def _ssim_ref(x, y):
    # Pure-JAX reference (mirrors the PyTorch module) for a sanity check.
    pad = ((0, 0), (0, 0), (1, 1), (1, 1))
    xp = jnp.pad(x, pad, mode="reflect")
    yp = jnp.pad(y, pad, mode="reflect")

    def pool(a):
        s = jnp.zeros(x.shape, jnp.float32)
        H, W = x.shape[2], x.shape[3]
        for di in range(3):
            for dj in range(3):
                s = s + a[:, :, di:di + H, dj:dj + W]
        return s / 9.0

    mu_x, mu_y = pool(xp), pool(yp)
    sigma_x = pool(xp * xp) - mu_x * mu_x
    sigma_y = pool(yp * yp) - mu_y * mu_y
    sigma_xy = pool(xp * yp) - mu_x * mu_y
    n = (2 * mu_x * mu_y + C1) * (2 * sigma_xy + C2)
    d = (mu_x ** 2 + mu_y ** 2 + C1) * (sigma_x + sigma_y + C2)
    return jnp.clip((1 - n / d) / 2, 0.0, 1.0)


if __name__ == "__main__":
    key = jax.random.PRNGKey(0)
    kx, ky = jax.random.split(key)
    N, C, H, W = 2, 4, 16, 16
    x = jax.random.uniform(kx, (N, C, H, W), dtype=jnp.float32)
    y = jax.random.uniform(ky, (N, C, H, W), dtype=jnp.float32)

    out = ssim(x, y)
    jax.block_until_ready(out)

    ref = _ssim_ref(x, y)
    assert out.shape == (N, C, H, W)
    err = float(jnp.max(jnp.abs(out - ref)))
    assert jnp.allclose(out, ref, atol=1e-5, rtol=1e-5), f"mismatch vs reference: {err}"

    print("KERNEL_OK")
</pallas_src>

<mosaic_0001>
module attributes {stable_mosaic.version = 11 : i64} {
  func.func @_ssim_kernel(%arg0: i32, %arg1: memref<1x16x128xf32, #tpu.memory_space<vmem>>, %arg2: memref<1x16x128xf32, #tpu.memory_space<vmem>>, %arg3: memref<1x16x128xf32, #tpu.memory_space<vmem>>) attributes {dimension_semantics = [#tpu.dimension_semantics<parallel>], iteration_bounds = array<i64: 1>, scalar_prefetch = 0 : i64, scratch_operands = 0 : i64, tpu.core_type = #tpu.core_type<tc>, window_params = [{transform_indices = @transform_0, window_bounds = array<i64: 1, 16, 128>}, {transform_indices = @transform_1, window_bounds = array<i64: 1, 16, 128>}, {transform_indices = @transform_2, window_bounds = array<i64: 1, 16, 128>}]} {
    %c0 = arith.constant 0 : index
    %c0_0 = arith.constant 0 : index
    %c0_1 = arith.constant 0 : index
    %0 = vector.load %arg1[%c0, %c0_0, %c0_1] : memref<1x16x128xf32, #tpu.memory_space<vmem>>, vector<1x16x128xf32>
    %c0_2 = arith.constant 0 : index
    %c0_3 = arith.constant 0 : index
    %c0_4 = arith.constant 0 : index
    %1 = vector.load %arg2[%c0_2, %c0_3, %c0_4] : memref<1x16x128xf32, #tpu.memory_space<vmem>>, vector<1x16x128xf32>
    %2 = tpu.iota {dimensions = array<i32: 2>} : vector<1x1x128xi32>
    %c16_i32 = arith.constant 16 : i32
    %c0_i32 = arith.constant 0 : i32
    %3 = arith.cmpi eq, %c16_i32, %c0_i32 : i32
    %c1_i32 = arith.constant 1 : i32
    %4 = arith.select %3, %c1_i32, %c16_i32 : i32
    %5 = vector.broadcast %4 : i32 to vector<1x1x128xi32>
    %6 = arith.remsi %2, %5 : vector<1x1x128xi32>
    %c0_i32_5 = arith.constant 0 : i32
    %7 = vector.broadcast %c0_i32_5 : i32 to vector<1x1x128xi32>
    %8 = arith.cmpi ne, %6, %7 : vector<1x1x128xi32>
    %c0_i32_6 = arith.constant 0 : i32
    %9 = vector.broadcast %c0_i32_6 : i32 to vector<1x1x128xi32>
    %10 = arith.cmpi slt, %6, %9 : vector<1x1x128xi32>
    %c0_i32_7 = arith.constant 0 : i32
    %11 = arith.cmpi slt, %4, %c0_i32_7 : i32
    %12 = vector.broadcast %11 : i1 to vector<1x1x128xi1>
    %13 = vector.broadcast %12 : vector<1x1x128xi1> to vector<1x1x128xi1>
    %14 = arith.xori %10, %13 : vector<1x1x128xi1>
    %15 = arith.andi %14, %8 : vector<1x1x128xi1>
    %16 = vector.broadcast %4 : i32 to vector<1x1x128xi32>
    %17 = arith.addi %6, %16 : vector<1x1x128xi32>
    %18 = arith.select %15, %17, %6 : vector<1x1x128xi1>, vector<1x1x128xi32>
    %c0_i32_8 = arith.constant 0 : i32
    %19 = vector.broadcast %c0_i32_8 : i32 to vector<1x1x128xi32>
    %20 = arith.cmpi eq, %18, %19 : vector<1x1x128xi32>
    %cst = arith.constant 1.000000e+00 : f32
    %cst_9 = arith.constant 0.000000e+00 : f32
    %21 = vector.broadcast %cst : f32 to vector<1x1x128xf32>
    %22 = vector.broadcast %cst_9 : f32 to vector<1x1x128xf32>
    %23 = arith.select %20, %21, %22 : vector<1x1x128xi1>, vector<1x1x128xf32>
    %c15_i32 = arith.constant 15 : i32
    %24 = vector.broadcast %c15_i32 : i32 to vector<1x1x128xi32>
    %25 = arith.cmpi eq, %18, %24 : vector<1x1x128xi32>
    %cst_10 = arith.constant -1.000000e+00 : f32
    %cst_11 = arith.constant 0.000000e+00 : f32
    %26 = vector.broadcast %cst_10 : f32 to vector<1x1x128xf32>
    %27 = vector.broadcast %cst_11 : f32 to vector<1x1x128xf32>
    %28 = arith.select %25, %26, %27 : vector<1x1x128xi1>, vector<1x1x128xf32>
    %29 = arith.addf %23, %28 : vector<1x1x128xf32>
    %30 = tpu.iota {dimensions = array<i32: 1>} : vector<1x16x1xi32>
    %c0_i32_12 = arith.constant 0 : i32
    %31 = vector.broadcast %c0_i32_12 : i32 to vector<1x16x1xi32>
    %32 = arith.cmpi eq, %30, %31 : vector<1x16x1xi32>
    %cst_13 = arith.constant 1.000000e+00 : f32
    %cst_14 = arith.constant 0.000000e+00 : f32
    %33 = vector.broadcast %cst_13 : f32 to vector<1x16x1xf32>
    %34 = vector.broadcast %cst_14 : f32 to vector<1x16x1xf32>
    %35 = arith.select %32, %33, %34 : vector<1x16x1xi1>, vector<1x16x1xf32>
    %c15_i32_15 = arith.constant 15 : i32
    %36 = vector.broadcast %c15_i32_15 : i32 to vector<1x16x1xi32>
    %37 = arith.cmpi eq, %30, %36 : vector<1x16x1xi32>
    %cst_16 = arith.constant -1.000000e+00 : f32
    %cst_17 = arith.constant 0.000000e+00 : f32
    %38 = vector.broadcast %cst_16 : f32 to vector<1x16x1xf32>
    %39 = vector.broadcast %cst_17 : f32 to vector<1x16x1xf32>
    %40 = arith.select %37, %38, %39 : vector<1x16x1xi1>, vector<1x16x1xf32>
    %41 = arith.addf %35, %40 : vector<1x16x1xf32>
    %42 = vector.shape_cast %29 : vector<1x1x128xf32> to vector<1x1x128xf32>
    %43 = vector.broadcast %42 : vector<1x1x128xf32> to vector<1x16x128xf32>
    %44 = vector.shape_cast %41 : vector<1x16x1xf32> to vector<1x16x1xf32>
    %45 = vector.broadcast %44 : vector<1x16x1xf32> to vector<1x16x128xf32>
    %c1_i32_18 = arith.constant 1 : i32
    %46 = tpu.dynamic_rotate %0 by %c1_i32_18 dim 2 : vector<1x16x128xf32>, i32 -> vector<1x16x128xf32>
    %c127_i32 = arith.constant 127 : i32
    %47 = tpu.dynamic_rotate %0 by %c127_i32 dim 2 : vector<1x16x128xf32>, i32 -> vector<1x16x128xf32>
    %48 = arith.addf %0, %46 : vector<1x16x128xf32>
    %49 = arith.addf %48, %47 : vector<1x16x128xf32>
    %50 = arith.subf %47, %46 : vector<1x16x128xf32>
    %51 = arith.mulf %43, %50 : vector<1x16x128xf32>
    %52 = arith.addf %49, %51 : vector<1x16x128xf32>
    %c1_i32_19 = arith.constant 1 : i32
    %53 = tpu.dynamic_rotate %52 by %c1_i32_19 dim 1 : vector<1x16x128xf32>, i32 -> vector<1x16x128xf32>
    %c15_i32_20 = arith.constant 15 : i32
    %54 = tpu.dynamic_rotate %52 by %c15_i32_20 dim 1 : vector<1x16x128xf32>, i32 -> vector<1x16x128xf32>
    %55 = arith.addf %52, %53 : vector<1x16x128xf32>
    %56 = arith.addf %55, %54 : vector<1x16x128xf32>
    %57 = arith.subf %54, %53 : vector<1x16x128xf32>
    %58 = arith.mulf %45, %57 : vector<1x16x128xf32>
    %59 = arith.addf %56, %58 : vector<1x16x128xf32>
    %c1_i32_21 = arith.constant 1 : i32
    %60 = tpu.dynamic_rotate %1 by %c1_i32_21 dim 2 : vector<1x16x128xf32>, i32 -> vector<1x16x128xf32>
    %c127_i32_22 = arith.constant 127 : i32
    %61 = tpu.dynamic_rotate %1 by %c127_i32_22 dim 2 : vector<1x16x128xf32>, i32 -> vector<1x16x128xf32>
    %62 = arith.addf %1, %60 : vector<1x16x128xf32>
    %63 = arith.addf %62, %61 : vector<1x16x128xf32>
    %64 = arith.subf %61, %60 : vector<1x16x128xf32>
    %65 = arith.mulf %43, %64 : vector<1x16x128xf32>
    %66 = arith.addf %63, %65 : vector<1x16x128xf32>
    %c1_i32_23 = arith.constant 1 : i32
    %67 = tpu.dynamic_rotate %66 by %c1_i32_23 dim 1 : vector<1x16x128xf32>, i32 -> vector<1x16x128xf32>
    %c15_i32_24 = arith.constant 15 : i32
    %68 = tpu.dynamic_rotate %66 by %c15_i32_24 dim 1 : vector<1x16x128xf32>, i32 -> vector<1x16x128xf32>
    %69 = arith.addf %66, %67 : vector<1x16x128xf32>
    %70 = arith.addf %69, %68 : vector<1x16x128xf32>
    %71 = arith.subf %68, %67 : vector<1x16x128xf32>
    %72 = arith.mulf %45, %71 : vector<1x16x128xf32>
    %73 = arith.addf %70, %72 : vector<1x16x128xf32>
    %74 = arith.mulf %0, %0 : vector<1x16x128xf32>
    %c1_i32_25 = arith.constant 1 : i32
    %75 = tpu.dynamic_rotate %74 by %c1_i32_25 dim 2 : vector<1x16x128xf32>, i32 -> vector<1x16x128xf32>
    %c127_i32_26 = arith.constant 127 : i32
    %76 = tpu.dynamic_rotate %74 by %c127_i32_26 dim 2 : vector<1x16x128xf32>, i32 -> vector<1x16x128xf32>
    %77 = arith.addf %74, %75 : vector<1x16x128xf32>
    %78 = arith.addf %77, %76 : vector<1x16x128xf32>
    %79 = arith.subf %76, %75 : vector<1x16x128xf32>
    %80 = arith.mulf %43, %79 : vector<1x16x128xf32>
    %81 = arith.addf %78, %80 : vector<1x16x128xf32>
    %c1_i32_27 = arith.constant 1 : i32
    %82 = tpu.dynamic_rotate %81 by %c1_i32_27 dim 1 : vector<1x16x128xf32>, i32 -> vector<1x16x128xf32>
    %c15_i32_28 = arith.constant 15 : i32
    %83 = tpu.dynamic_rotate %81 by %c15_i32_28 dim 1 : vector<1x16x128xf32>, i32 -> vector<1x16x128xf32>
    %84 = arith.addf %81, %82 : vector<1x16x128xf32>
    %85 = arith.addf %84, %83 : vector<1x16x128xf32>
    %86 = arith.subf %83, %82 : vector<1x16x128xf32>
    %87 = arith.mulf %45, %86 : vector<1x16x128xf32>
    %88 = arith.addf %85, %87 : vector<1x16x128xf32>
    %89 = arith.mulf %1, %1 : vector<1x16x128xf32>
    %c1_i32_29 = arith.constant 1 : i32
    %90 = tpu.dynamic_rotate %89 by %c1_i32_29 dim 2 : vector<1x16x128xf32>, i32 -> vector<1x16x128xf32>
    %c127_i32_30 = arith.constant 127 : i32
    %91 = tpu.dynamic_rotate %89 by %c127_i32_30 dim 2 : vector<1x16x128xf32>, i32 -> vector<1x16x128xf32>
    %92 = arith.addf %89, %90 : vector<1x16x128xf32>
    %93 = arith.addf %92, %91 : vector<1x16x128xf32>
    %94 = arith.subf %91, %90 : vector<1x16x128xf32>
    %95 = arith.mulf %43, %94 : vector<1x16x128xf32>
    %96 = arith.addf %93, %95 : vector<1x16x128xf32>
    %c1_i32_31 = arith.constant 1 : i32
    %97 = tpu.dynamic_rotate %96 by %c1_i32_31 dim 1 : vector<1x16x128xf32>, i32 -> vector<1x16x128xf32>
    %c15_i32_32 = arith.constant 15 : i32
    %98 = tpu.dynamic_rotate %96 by %c15_i32_32 dim 1 : vector<1x16x128xf32>, i32 -> vector<1x16x128xf32>
    %99 = arith.addf %96, %97 : vector<1x16x128xf32>
    %100 = arith.addf %99, %98 : vector<1x16x128xf32>
    %101 = arith.subf %98, %97 : vector<1x16x128xf32>
    %102 = arith.mulf %45, %101 : vector<1x16x128xf32>
    %103 = arith.addf %100, %102 : vector<1x16x128xf32>
    %104 = arith.mulf %0, %1 : vector<1x16x128xf32>
    %c1_i32_33 = arith.constant 1 : i32
    %105 = tpu.dynamic_rotate %104 by %c1_i32_33 dim 2 : vector<1x16x128xf32>, i32 -> vector<1x16x128xf32>
    %c127_i32_34 = arith.constant 127 : i32
    %106 = tpu.dynamic_rotate %104 by %c127_i32_34 dim 2 : vector<1x16x128xf32>, i32 -> vector<1x16x128xf32>
    %107 = arith.addf %104, %105 : vector<1x16x128xf32>
    %108 = arith.addf %107, %106 : vector<1x16x128xf32>
    %109 = arith.subf %106, %105 : vector<1x16x128xf32>
    %110 = arith.mulf %43, %109 : vector<1x16x128xf32>
    %111 = arith.addf %108, %110 : vector<1x16x128xf32>
    %c1_i32_35 = arith.constant 1 : i32
    %112 = tpu.dynamic_rotate %111 by %c1_i32_35 dim 1 : vector<1x16x128xf32>, i32 -> vector<1x16x128xf32>
    %c15_i32_36 = arith.constant 15 : i32
    %113 = tpu.dynamic_rotate %111 by %c15_i32_36 dim 1 : vector<1x16x128xf32>, i32 -> vector<1x16x128xf32>
    %114 = arith.addf %111, %112 : vector<1x16x128xf32>
    %115 = arith.addf %114, %113 : vector<1x16x128xf32>
    %116 = arith.subf %113, %112 : vector<1x16x128xf32>
    %117 = arith.mulf %45, %116 : vector<1x16x128xf32>
    %118 = arith.addf %115, %117 : vector<1x16x128xf32>
    %119 = arith.mulf %59, %73 : vector<1x16x128xf32>
    %cst_37 = arith.constant 2.000000e+00 : f32
    %120 = vector.broadcast %cst_37 : f32 to vector<1x16x128xf32>
    %121 = arith.mulf %120, %119 : vector<1x16x128xf32>
    %122 = arith.mulf %59, %59 : vector<1x16x128xf32>
    %123 = arith.mulf %73, %73 : vector<1x16x128xf32>
    %124 = arith.addf %122, %123 : vector<1x16x128xf32>
    %cst_38 = arith.constant 8.100000e-03 : f32
    %125 = vector.broadcast %cst_38 : f32 to vector<1x16x128xf32>
    %126 = arith.addf %121, %125 : vector<1x16x128xf32>
    %cst_39 = arith.constant 1.800000e+01 : f32
    %127 = vector.broadcast %cst_39 : f32 to vector<1x16x128xf32>
    %128 = arith.mulf %127, %118 : vector<1x16x128xf32>
    %129 = arith.subf %128, %121 : vector<1x16x128xf32>
    %cst_40 = arith.constant 7.290000e-02 : f32
    %130 = vector.broadcast %cst_40 : f32 to vector<1x16x128xf32>
    %131 = arith.addf %129, %130 : vector<1x16x128xf32>
    %132 = arith.mulf %126, %131 : vector<1x16x128xf32>
    %cst_41 = arith.constant 8.100000e-03 : f32
    %133 = vector.broadcast %cst_41 : f32 to vector<1x16x128xf32>
    %134 = arith.addf %124, %133 : vector<1x16x128xf32>
    %135 = arith.addf %88, %103 : vector<1x16x128xf32>
    %cst_42 = arith.constant 9.000000e+00 : f32
    %136 = vector.broadcast %cst_42 : f32 to vector<1x16x128xf32>
    %137 = arith.mulf %136, %135 : vector<1x16x128xf32>
    %138 = arith.subf %137, %124 : vector<1x16x128xf32>
    %cst_43 = arith.constant 7.290000e-02 : f32
    %139 = vector.broadcast %cst_43 : f32 to vector<1x16x128xf32>
    %140 = arith.addf %138, %139 : vector<1x16x128xf32>
    %141 = arith.mulf %134, %140 : vector<1x16x128xf32>
    %142 = tpu.reciprocal %141 {approx = true} : vector<1x16x128xf32> -> vector<1x16x128xf32>
    %143 = arith.mulf %141, %142 : vector<1x16x128xf32>
    %cst_44 = arith.constant 2.000000e+00 : f32
    %144 = vector.broadcast %cst_44 : f32 to vector<1x16x128xf32>
    %145 = arith.subf %144, %143 : vector<1x16x128xf32>
    %146 = arith.mulf %142, %145 : vector<1x16x128xf32>
    %147 = arith.mulf %141, %146 : vector<1x16x128xf32>
    %cst_45 = arith.constant 2.000000e+00 : f32
    %148 = vector.broadcast %cst_45 : f32 to vector<1x16x128xf32>
    %149 = arith.subf %148, %147 : vector<1x16x128xf32>
    %150 = arith.mulf %146, %149 : vector<1x16x128xf32>
    %151 = arith.mulf %132, %150 : vector<1x16x128xf32>
    %cst_46 = arith.constant 1.000000e+00 : f32
    %152 = vector.broadcast %cst_46 : f32 to vector<1x16x128xf32>
    %153 = arith.subf %152, %151 : vector<1x16x128xf32>
    %cst_47 = arith.constant 5.000000e-01 : f32
    %154 = vector.broadcast %cst_47 : f32 to vector<1x16x128xf32>
    %155 = arith.mulf %153, %154 : vector<1x16x128xf32>
    %cst_48 = arith.constant 0.000000e+00 : f32
    %cst_49 = arith.constant 1.000000e+00 : f32
    %156 = vector.broadcast %cst_48 : f32 to vector<1x16x128xf32>
    %157 = arith.maximumf %156, %155 : vector<1x16x128xf32>
    %158 = vector.broadcast %cst_49 : f32 to vector<1x16x128xf32>
    %159 = arith.minimumf %158, %157 : vector<1x16x128xf32>
    %c0_50 = arith.constant 0 : index
    %c0_51 = arith.constant 0 : index
    %c0_52 = arith.constant 0 : index
    %160 = vector.load %arg3[%c0_50, %c0_51, %c0_52] : memref<1x16x128xf32, #tpu.memory_space<vmem>>, vector<1x16x128xf32>
    tpu.vector_store %arg3[%c0_50, %c0_51, %c0_52], %159 {strides = array<i32>} : memref<1x16x128xf32, #tpu.memory_space<vmem>>, vector<1x16x128xf32>,
    return
  }
  func.func @transform_0(%arg0: i32) -> (i32, i32, i32) {
    %c0_i32 = arith.constant 0 : i32
    %c0_i32_0 = arith.constant 0 : i32
    %c0_i32_1 = arith.constant 0 : i32
    return %arg0, %c0_i32, %c0_i32_0 : i32, i32, i32
  }
  func.func @transform_1(%arg0: i32) -> (i32, i32, i32) {
    %c0_i32 = arith.constant 0 : i32
    %c0_i32_0 = arith.constant 0 : i32
    %c0_i32_1 = arith.constant 0 : i32
    return %arg0, %c0_i32, %c0_i32_0 : i32, i32, i32
  }
  func.func @transform_2(%arg0: i32) -> (i32, i32, i32) {
    %c0_i32 = arith.constant 0 : i32
    %c0_i32_0 = arith.constant 0 : i32
    %c0_i32_1 = arith.constant 0 : i32
    return %arg0, %c0_i32, %c0_i32_0 : i32, i32, i32
  }
}

</mosaic_0001>

<bundles_post_ra>
// kernel: tpu_custom_call.1
= control target key start
LH: loop header
LB: loop body
LE: loop exit
PB: predicated region body
PF: predicated region fallthrough
CT: control target
= control target key end

     0   :  { %7 = vsyncpa [#allocation3], 0  ;;  %s593_s0 = inlined_call_operand.hbm [shape: f32[1,16,128], index: 0, kind: input, shape index: {}]   ;;  %s594_s1 = inlined_call_operand.hbm [shape: f32[1,16,128], index: 1, kind: input, shape index: {}]   ;;  %s595_s2 = inlined_call_operand.hbm [shape: f32[1,16,128], index: 2, kind: output, shape index: {}]  }
   0x1   :  { %8 = vsyncpa [#allocation6], 0 }
   0x2   :  { %9 = vsyncpa [#allocation4], 0  ;;  %s14_s11 = sshll.u32 %s593_s0, 4  ;;  %s436_s12 = smov [#allocation2]   ;;  %s15_s11 = int_to_ptr.hbm [resolvable:$true] %s14_s11 }
   0x3   :  { %s16_s13 = sshll.u32 %s436_s12, 4  ;;  %s27_s16 = sshll.u32 %s594_s1, 4  ;;  %s17_s13 = int_to_ptr.vmem [resolvable:$true] %s16_s13  ;;  %s28_s16 = int_to_ptr.hbm [resolvable:$true] %s27_s16 }
   0x4   :  { %s437_s17 = smov 128   ;;  %s438_s18 = smov 8  }
   0x5   :  { %22 = dma.hbm_to_vmem [thread:$0]  %s15_s11, 256, %s17_s13, [#allocation3], %s437_s17, %s437_s17, %s438_s18  }
   0x6   :  { %s439_s19 = smov [#allocation5]  }
   0x7   :  { %s29_s20 = sshll.u32 %s439_s19, 4  ;;  %s30_s20 = int_to_ptr.vmem [resolvable:$true] %s29_s20 }
   0x8   :  { %35 = dma.hbm_to_vmem [thread:$0]  %s28_s16, 256, %s30_s20, [#allocation6], %s437_s17, %s437_s17, %s438_s18  }
   0x9   :  { %430 = dma.done.wait [#allocation3], 256  }
   0xa   :  { %431 = vsyncadd [#allocation3], 4294967040 }
   0xb   :  { %432 = dma.done.wait [#allocation6], 256  }
   0xc   :  { %433 = vsyncadd [#allocation6], 4294967040  ;;  %v44_v0 = vld [vmem:[#allocation2] sm:$0xff]  ;;  %s440_s0 = smov 127   ;;  %s441_s1 = smov 1   ;;  %v46_v1 = vld [vmem:[#allocation5] sm:$0xff]  ;;  %v48_v12 = vlaneseq }
   0xd   :  { %84 = vrot.lane.b32.xlu1 %v44_v0, %s440_s0  ;;  %80 = vrot.lane.b32.xlu0 %v44_v0, %s441_s1  ;;  %v45_v2 = vld [vmem:[#allocation2 + $0x8] sm:$0xff]  ;;  %v47_v3 = vld [vmem:[#allocation5 + $0x8] sm:$0xff]  ;;  %v154_v4 = vmul.f32 %v44_v0, %v44_v0  ;;  %v471_v6 = vmul.f32 %v46_v1, %v46_v1  ;;  %v478_v8 = vmul.f32 %v46_v1, %v44_v0  ;;  %v442_v20 = vmov 0.0   ;;  %s443_s21 = smov [#allocation7]   ;;  %s332_s25 = sshll.u32 %s595_s2, 4  ;;  %s333_s25 = int_to_ptr.hbm [resolvable:$true] %s332_s25 }
   0xe   :  { %118 = vrot.lane.b32.xlu2 %v46_v1, %s441_s1  ;;  %v155_v5 = vmul.f32 %v45_v2, %v45_v2  ;;  %v473_v7 = vmul.f32 %v47_v3, %v47_v3  ;;  %v480_v9 = vmul.f32 %v47_v3, %v45_v2  ;;  %v49_v15 = vand.u32 127, %v48_v12  ;;  %s330_s22 = sshll.u32 %s443_s21, 4  ;;  %s331_s22 = int_to_ptr.vmem [resolvable:$true] %s330_s22 }
   0xf   :  { %v495_v45 = vshrl.u32 %v48_v12, 7 }
  0x10   :  { %v54_v16 = vand.u32 15, %v49_v15 }
  0x11   :  { %vm100_vm2 = vcmp.lt.s32.totalorder %v495_v45, 1  ;;  %vm70_vm3 = vcmp.eq.s32.totalorder %v495_v45, 0  ;;  %vm105_vm4 = vcmp.lt.s32.totalorder %v495_v45, 7 }
  0x12   :  { %vm62_vm0 = vcmp.eq.s32.totalorder %v54_v16, 0  ;;  %vm64_vm1 = vcmp.eq.s32.totalorder %v54_v16, 15  ;;  %v512_v15 = vsel %vm70_vm3, 1.0, %v442_v20 }
  0x13   :  { %v63_v21 = vsel %vm62_vm0, 1.0, %v442_v20  ;;  %v65_v22 = vsel %vm64_vm1, -1.0, %v442_v20 }
  0x14   :  { %v489_v28 = vadd.f32 %v65_v22, %v63_v21 }
  0x15   :  { %86 = vrot.lane.b32.xlu1 %v45_v2, %s440_s0  ;;  %82 = vrot.lane.b32.xlu0 %v45_v2, %s441_s1 }
  0x16   :  { %120 = vrot.lane.b32.xlu2 %v47_v3, %s441_s1 }
  0x1d   :  { %124 = vrot.lane.b32.xlu1 %v47_v3, %s440_s0  ;;  %122 = vrot.lane.b32.xlu0 %v46_v1, %s440_s0 }
  0x1e   :  { %156 = vrot.lane.b32.xlu2 %v154_v4, %s441_s1 }
  0x25   :  { %158 = vrot.lane.b32.xlu0 %v155_v5, %s441_s1  ;;  %160 = vrot.lane.b32.xlu1 %v154_v4, %s440_s0 }
  0x26   :  { %162 = vrot.lane.b32.xlu2 %v155_v5, %s440_s0 }
  0x2d   :  { %194 = vrot.lane.b32.xlu0 %v471_v6, %s441_s1  ;;  %196 = vrot.lane.b32.xlu1 %v473_v7, %s441_s1 }
  0x2e   :  { %198 = vrot.lane.b32.xlu2 %v471_v6, %s440_s0 }
  0x35   :  { %200 = vrot.lane.b32.xlu0 %v473_v7, %s440_s0  ;;  %232 = vrot.lane.b32.xlu1 %v478_v8, %s441_s1 }
  0x36   :  { %234 = vrot.lane.b32.xlu2 %v480_v9, %s441_s1 }
  0x3d   :  { %236 = vrot.lane.b32.xlu0 %v478_v8, %s440_s0  ;;  %238 = vrot.lane.b32.xlu1 %v480_v9, %s440_s0 }
  0x68   :  { %v119_v10 = vpop.permute.xlu2 %118 }
  0x69   :  { %v126_v31 = vadd.f32 %v119_v10, %v46_v1  ;;  %v69_v1 = vadd.s32 8, %v495_v45 }
  0x6b   :  { %vm75_vm5 = vcmp.eq.s32.totalorder %v69_v1, 15 }
  0x70   :  { %v121_v14 = vpop.permute.xlu2 %120 }
  0x71   :  { %v127_v23 = vadd.f32 %v121_v14, %v47_v3 }
  0x78   :  { %v157_v19 = vpop.permute.xlu2 %156 }
  0x79   :  { %v164_v47 = vadd.f32 %v157_v19, %v154_v4 }
  0x7f   :  { %v85_v11 = vpop.permute.xlu1 %84  ;;  %v81_v13 = vpop.permute.xlu0 %80 }
  0x80   :  { %v88_v29 = vadd.f32 %v81_v13, %v44_v0  ;;  %v92_v30 = vsub.f32 %v85_v11, %v81_v13  ;;  %v163_v44 = vpop.permute.xlu2 %162 }
  0x82   :  { %v90_v40 = vadd.f32 %v88_v29, %v85_v11  ;;  %v94_v41 = vmul.f32 %v92_v30, %v489_v28 }
  0x84   :  { %v96_v50 = vadd.f32 %v94_v41, %v90_v40 }
  0x86   :  { %v98_v0 = vrot.slane %v96_v50, 7 }
  0x87   :  { %v87_v17 = vpop.permute.xlu1 %86  ;;  %v83_v18 = vpop.permute.xlu0 %82 }
  0x88   :  { %v89_v24 = vadd.f32 %v83_v18, %v45_v2  ;;  %v93_v25 = vsub.f32 %v87_v17, %v83_v18  ;;  %v103_v2 = vrot.slane %v96_v50, 1 }
  0x8a   :  { %v91_v35 = vadd.f32 %v89_v24, %v87_v17  ;;  %v95_v36 = vmul.f32 %v93_v25, %v489_v28 }
  0x8c   :  { %v97_v46 = vadd.f32 %v95_v36, %v91_v35 }
  0x8e   :  { %v99_v58 = vrot.slane %v97_v46, 7  ;;  %v104_v60 = vrot.slane %v97_v46, 1 }
  0x8f   :  { %v125_v26 = vpop.permute.xlu1 %124  ;;  %v123_v27 = vpop.permute.xlu0 %122 }
  0x90   :  { %v129_v32 = vadd.f32 %v127_v23, %v125_v26  ;;  %v131_v33 = vsub.f32 %v125_v26, %v121_v14  ;;  %v130_v34 = vsub.f32 %v123_v27, %v119_v10  ;;  %v128_v38 = vadd.f32 %v126_v31, %v123_v27  ;;  %v199_v26 = vpop.permute.xlu2 %198 }
  0x91   :  { %v102_v10 = vsel %vm100_vm2, %v99_v58, %v98_v0  ;;  %v106_v16 = vsel %vm105_vm4, %v103_v2, %v104_v60  ;;  %v107_v17 = vsel %vm105_vm4, %v104_v60, %v103_v2 }
  0x92   :  { %v133_v37 = vmul.f32 %v131_v33, %v489_v28  ;;  %v132_v39 = vmul.f32 %v130_v34, %v489_v28  ;;  %v108_v22 = vadd.f32 %v102_v10, %v96_v50  ;;  %v112_v27 = vsub.f32 %v106_v16, %v102_v10 }
  0x94   :  { %v135_v42 = vadd.f32 %v133_v37, %v129_v32  ;;  %v134_v43 = vadd.f32 %v132_v39, %v128_v38  ;;  %v524_v32 = vsel %vm75_vm5, -1.0, %v442_v20  ;;  %v110_v40 = vadd.f32 %v108_v22, %v106_v16 }
  0x96   :  { %v137_v54 = vrot.slane %v135_v42, 7  ;;  %v141_v55 = vrot.slane %v135_v42, 1  ;;  %v136_v56 = vrot.slane %v134_v43, 7  ;;  %v140_v57 = vrot.slane %v134_v43, 1 }
  0x97   :  { %v159_v48 = vpop.permute.xlu0 %158  ;;  %v161_v49 = vpop.permute.xlu1 %160 }
  0x98   :  { %v165_v51 = vadd.f32 %v159_v48, %v155_v5  ;;  %v168_v52 = vsub.f32 %v161_v49, %v157_v19  ;;  %v169_v53 = vsub.f32 %v163_v44, %v159_v48  ;;  %v166_v59 = vadd.f32 %v164_v47, %v161_v49 }
  0x99   :  { %v139_v3 = vsel %vm100_vm2, %v137_v54, %v136_v56  ;;  %v142_v4 = vsel %vm105_vm4, %v140_v57, %v141_v55  ;;  %v101_v5 = vsel %vm100_vm2, %v98_v0, %v99_v58  ;;  %v138_v18 = vsel %vm100_vm2, %v136_v56, %v137_v54  ;;  %v235_v58 = vpop.permute.xlu2 %234 }
  0x9a   :  { %v170_v61 = vmul.f32 %v168_v52, %v489_v28  ;;  %v167_v62 = vadd.f32 %v165_v51, %v163_v44  ;;  %v171_v63 = vmul.f32 %v169_v53, %v489_v28  ;;  %v144_v19 = vadd.f32 %v139_v3, %v134_v43 }
  0x9b   :  { %v148_v21 = vsub.f32 %v142_v4, %v139_v3  ;;  %v109_v23 = vadd.f32 %v101_v5, %v97_v46  ;;  %v143_v24 = vsel %vm105_vm4, %v141_v55, %v140_v57  ;;  %v113_v29 = vsub.f32 %v107_v17, %v101_v5 }
  0x9c   :  { %v172_v11 = vadd.f32 %v170_v61, %v166_v59  ;;  %v173_v12 = vadd.f32 %v171_v63, %v167_v62  ;;  %v145_v33 = vadd.f32 %v138_v18, %v135_v42  ;;  %v146_v36 = vadd.f32 %v144_v19, %v142_v4 }
  0x9d   :  { %v149_v37 = vsub.f32 %v143_v24, %v138_v18  ;;  %v150_v38 = vmul.f32 %v148_v21, %v512_v15  ;;  %v111_v41 = vadd.f32 %v109_v23, %v107_v17  ;;  %v114_v44 = vmul.f32 %v112_v27, %v512_v15 }
  0x9e   :  { %v174_v30 = vrot.slane %v172_v11, 7  ;;  %v175_v31 = vrot.slane %v173_v12, 7  ;;  %v178_v34 = vrot.slane %v172_v11, 1  ;;  %v179_v35 = vrot.slane %v173_v12, 1 }
  0x9f   :  { %v195_v13 = vpop.permute.xlu0 %194  ;;  %v197_v14 = vpop.permute.xlu1 %196  ;;  %v115_v46 = vmul.f32 %v113_v29, %v524_v32  ;;  %v147_v52 = vadd.f32 %v145_v33, %v143_v24  ;;  %v151_v53 = vmul.f32 %v149_v37, %v524_v32  ;;  %v540_v54 = vadd.f32 %v150_v38, %v146_v36 }
  0xa0   :  { %v202_v25 = vadd.f32 %v195_v13, %v471_v6  ;;  %v206_v39 = vsub.f32 %v199_v26, %v195_v13  ;;  %v203_v6 = vadd.f32 %v197_v14, %v473_v7  ;;  %v176_v20 = vsel %vm100_vm2, %v174_v30, %v175_v31 }
  0xa1   :  { %v177_v49 = vsel %vm100_vm2, %v175_v31, %v174_v30  ;;  %v180_v50 = vsel %vm105_vm4, %v178_v34, %v179_v35  ;;  %v181_v7 = vsel %vm105_vm4, %v179_v35, %v178_v34  ;;  %v183_v60 = vadd.f32 %v176_v20, %v173_v12 }
  0xa2   :  { %v204_v43 = vadd.f32 %v202_v25, %v199_v26  ;;  %v208_v42 = vmul.f32 %v206_v39, %v489_v28  ;;  %v182_v59 = vadd.f32 %v177_v49, %v172_v11  ;;  %v186_v61 = vsub.f32 %v180_v50, %v177_v49 }
  0xa3   :  { %v187_v62 = vsub.f32 %v181_v7, %v176_v20  ;;  %v543_v63 = vadd.f32 %v115_v46, %v111_v41  ;;  %v545_v0 = vadd.f32 %v114_v44, %v110_v40  ;;  %v547_v2 = vadd.f32 %v151_v53, %v147_v52 }
  0xa4   :  { %v210_v55 = vadd.f32 %v208_v42, %v204_v43  ;;  %v274_v3 = vmul.f32 %v540_v54, %v540_v54  ;;  %v241_v5 = vadd.f32 %v235_v58, %v480_v9  ;;  %v185_v16 = vadd.f32 %v183_v60, %v181_v7 }
  0xa5   :  { %v188_v17 = vmul.f32 %v186_v61, %v512_v15  ;;  %v189_v18 = vmul.f32 %v187_v62, %v524_v32  ;;  %v272_v38 = vmul.f32 %v545_v0, %v545_v0  ;;  %v275_v39 = vmul.f32 %v547_v2, %v547_v2 }
  0xa6   :  { %v212_v10 = vrot.slane %v210_v55, 7  ;;  %v216_v13 = vrot.slane %v210_v55, 1 }
  0xa7   :  { %v201_v47 = vpop.permute.xlu0 %200  ;;  %v233_v48 = vpop.permute.xlu1 %232  ;;  %v191_v43 = vadd.f32 %v189_v18, %v185_v16 }
  0xa8   :  { %v207_v51 = vsub.f32 %v201_v47, %v197_v14  ;;  %v205_v56 = vadd.f32 %v203_v6, %v201_v47  ;;  %v240_v4 = vadd.f32 %v233_v48, %v478_v8  ;;  %v184_v14 = vadd.f32 %v182_v59, %v180_v50 }
  0xa9   :  { %v273_v47 = vmul.f32 %v543_v63, %v543_v63 }
  0xaa   :  { %v209_v57 = vmul.f32 %v207_v51, %v489_v28  ;;  %v190_v6 = vadd.f32 %v188_v17, %v184_v14 }
  0xac   :  { %v211_v1 = vadd.f32 %v209_v57, %v205_v56 }
  0xae   :  { %v213_v11 = vrot.slane %v211_v1, 7  ;;  %v217_v12 = vrot.slane %v211_v1, 1 }
  0xaf   :  { %v237_v19 = vpop.permute.xlu0 %236  ;;  %v239_v21 = vpop.permute.xlu1 %238 }
  0xb0   :  { %v214_v22 = vsel %vm100_vm2, %v212_v10, %v213_v11  ;;  %v215_v8 = vsel %vm100_vm2, %v213_v11, %v212_v10  ;;  %v218_v9 = vsel %vm105_vm4, %v216_v13, %v217_v12  ;;  %v219_v23 = vsel %vm105_vm4, %v217_v12, %v216_v13 }
  0xb1   :  { %v220_v24 = vadd.f32 %v215_v8, %v210_v55  ;;  %v221_v25 = vadd.f32 %v214_v22, %v211_v1  ;;  %v224_v26 = vsub.f32 %v218_v9, %v215_v8  ;;  %v225_v27 = vsub.f32 %v219_v23, %v214_v22 }
  0xb2   :  { %v242_v29 = vadd.f32 %v240_v4, %v237_v19  ;;  %v244_v30 = vsub.f32 %v237_v19, %v233_v48  ;;  %v243_v31 = vadd.f32 %v241_v5, %v239_v21  ;;  %v245_v33 = vsub.f32 %v239_v21, %v235_v58 }
  0xb3   :  { %v222_v34 = vadd.f32 %v220_v24, %v218_v9  ;;  %v223_v35 = vadd.f32 %v221_v25, %v219_v23  ;;  %v226_v36 = vmul.f32 %v224_v26, %v512_v15  ;;  %v227_v37 = vmul.f32 %v225_v27, %v524_v32 }
  0xb4   :  { %v246_v40 = vmul.f32 %v244_v30, %v489_v28  ;;  %v247_v41 = vmul.f32 %v245_v33, %v489_v28  ;;  %v276_v48 = vadd.f32 %v274_v3, %v272_v38  ;;  %v277_v55 = vadd.f32 %v275_v39, %v273_v47 }
  0xb5   :  { %v228_v44 = vadd.f32 %v226_v36, %v222_v34  ;;  %v229_v46 = vadd.f32 %v227_v37, %v223_v35  ;;  %v268_v8 = vmul.f32 %v540_v54, %v545_v0  ;;  %v269_v9 = vmul.f32 %v547_v2, %v543_v63 }
  0xb6   :  { %v248_v20 = vadd.f32 %v246_v40, %v242_v29  ;;  %v249_v42 = vadd.f32 %v247_v41, %v243_v31  ;;  %v288_v4 = vadd.f32 0.0081, %v276_v48  ;;  %v289_v11 = vadd.f32 0.0081, %v277_v55 }
  0xb7   :  { %v290_v49 = vadd.f32 %v228_v44, %v190_v6  ;;  %v291_v50 = vadd.f32 %v229_v46, %v191_v43  ;;  %v271_v29 = vmul.f32 2.0, %v269_v9 }
  0xb8   :  { %v250_v7 = vrot.slane %v248_v20, 7  ;;  %v254_v51 = vrot.slane %v248_v20, 1  ;;  %v251_v52 = vrot.slane %v249_v42, 7  ;;  %v255_v53 = vrot.slane %v249_v42, 1 }
  0xb9   :  { %v292_v56 = vmul.f32 9.0, %v290_v49  ;;  %v293_v57 = vmul.f32 9.0, %v291_v50  ;;  %v279_v2 = vadd.f32 0.0081, %v271_v29 }
  0xba   :  { %v252_v28 = vsel %vm100_vm2, %v250_v7, %v251_v52  ;;  %v253_v58 = vsel %vm100_vm2, %v251_v52, %v250_v7  ;;  %v256_v59 = vsel %vm105_vm4, %v254_v51, %v255_v53  ;;  %v257_v60 = vsel %vm105_vm4, %v255_v53, %v254_v51 }
  0xbb   :  { %v294_v61 = vsub.f32 %v292_v56, %v276_v48  ;;  %v295_v62 = vsub.f32 %v293_v57, %v277_v55  ;;  %v258_v1 = vadd.f32 %v253_v58, %v248_v20  ;;  %v259_v3 = vadd.f32 %v252_v28, %v249_v42 }
  0xbc   :  { %v262_v5 = vsub.f32 %v256_v59, %v253_v58  ;;  %v263_v10 = vsub.f32 %v257_v60, %v252_v28 }
  0xbd   :  { %v297_v13 = vadd.f32 0.0729, %v295_v62  ;;  %v296_v12 = vadd.f32 0.0729, %v294_v61  ;;  %v260_v14 = vadd.f32 %v258_v1, %v256_v59  ;;  %v261_v17 = vadd.f32 %v259_v3, %v257_v60 }
  0xbe   :  { %v264_v16 = vmul.f32 %v262_v5, %v512_v15  ;;  %v265_v18 = vmul.f32 %v263_v10, %v524_v32  ;;  %v270_v15 = vmul.f32 2.0, %v268_v8 }
  0xbf   :  { %v298_v19 = vmul.f32 %v296_v12, %v288_v4  ;;  %v299_v21 = vmul.f32 %v297_v13, %v289_v11 }
  0xc0   :  { %v266_v45 = vadd.f32 %v264_v16, %v260_v14  ;;  %v267_v22 = vadd.f32 %v265_v18, %v261_v17  ;;  %v278_v39 = vadd.f32 0.0081, %v270_v15 }
  0xc1   :  { %354 = vrcp.f32 %v298_v19 }
  0xc2   :  { %356 = vrcp.f32 %v299_v21  ;;  %v280_v23 = vmul.f32 18.0, %v266_v45  ;;  %v281_v25 = vmul.f32 18.0, %v267_v22 }
  0xc4   :  { %v282_v30 = vsub.f32 %v280_v23, %v270_v15  ;;  %v283_v33 = vsub.f32 %v281_v25, %v271_v29 }
  0xc6   :  { %v284_v37 = vadd.f32 0.0729, %v282_v30  ;;  %v285_v54 = vadd.f32 0.0729, %v283_v33 }
  0xc7   :  { %v355_v24 = vpop.eup %354 }
  0xc8   :  { %v357_v26 = vpop.eup %356  ;;  %v302_v27 = vmul.f32 %v355_v24, %v298_v19  ;;  %v286_v41 = vmul.f32 %v284_v37, %v278_v39  ;;  %v287_v43 = vmul.f32 %v285_v54, %v279_v2 }
  0xc9   :  { %v303_v32 = vmul.f32 %v357_v26, %v299_v21 }
  0xca   :  { %v304_v31 = vsub.f32 2.0, %v302_v27 }
  0xcb   :  { %v305_v34 = vsub.f32 2.0, %v303_v32 }
  0xcc   :  { %v306_v35 = vmul.f32 %v355_v24, %v304_v31 }
  0xcd   :  { %v307_v36 = vmul.f32 %v357_v26, %v305_v34 }
  0xce   :  { %v308_v38 = vmul.f32 %v306_v35, %v298_v19 }
  0xcf   :  { %v309_v0 = vmul.f32 %v307_v36, %v299_v21 }
  0xd0   :  { %v310_v63 = vsub.f32 2.0, %v308_v38 }
  0xd1   :  { %v311_v40 = vsub.f32 2.0, %v309_v0 }
  0xd2   :  { %v312_v6 = vmul.f32 %v310_v63, %v306_v35 }
  0xd3   :  { %v313_v44 = vmul.f32 %v311_v40, %v307_v36 }
  0xd4   :  { %v314_v46 = vmul.f32 %v312_v6, %v286_v41 }
  0xd5   :  { %v315_v20 = vmul.f32 %v313_v44, %v287_v43 }
  0xd6   :  { %v316_v42 = vsub.f32 1.0, %v314_v46 }
  0xd7   :  { %v317_v47 = vsub.f32 1.0, %v315_v20 }
  0xd8   :  { %v318_v48 = vmul.f32 0.5, %v316_v42 }
  0xd9   :  { %v319_v49 = vmul.f32 0.5, %v317_v47 }
  0xda   :  { %v320_v50 = vmax.f32 %v318_v48, 0.0 }
  0xdb   :  { %v321_v7 = vmax.f32 %v319_v49, 0.0 }
  0xdc   :  { %v322_v51 = vmin.f32 %v320_v50, 1.0 }
  0xdd   :  { %v323_v52 = vmin.f32 %v321_v7, 1.0 }
  0xde   :  { %324 = vst [vmem:[#allocation7] sm:$0xff] %v322_v51 }
  0xdf   :  { %325 = vst [vmem:[#allocation7 + $0x8] sm:$0xff] %v323_v52 }
  0xe0   :  { %338 = dma.vmem_to_hbm [thread:$0]  %s331_s22, 256, %s333_s25, [#allocation4], %s437_s17, %s437_s17, %s438_s18  }
  0xe1   :  { %434 = dma.done.wait [#allocation4], 256  }
  0xe2   :  { %435 = vsyncadd [#allocation4], 4294967040 }
  0xe3   :  { %343 = vsyncpa [#allocation3], 1 }
  0xe4   :  { %344 = vsyncpa [#allocation6], 1 }
  0xe5   :  { %345 = vsyncpa [#allocation4], 1 }

</bundles_post_ra>
